<compile_context>
chip_gen: v6e
topology: v6e:2x2x1
jax: 0.10.0
libtpu: 0.0.40
codegen_flags: <defaults>
</compile_context>

<pallas_src>
from collections import namedtuple

import jax
import jax.numpy as jnp
from jax.experimental import pallas as pl
from jax.experimental.pallas import tpu as pltpu

model_output = namedtuple("output", ["vertices", "global_orient", "transl"])


# --------------------------------------------------------------------------
# Glue: axis-angle -> rotation matrix (exact port of smplx batch_rodrigues).
# --------------------------------------------------------------------------
def batch_rodrigues(rot_vecs, epsilon=1e-8):
    angle = jnp.linalg.norm(rot_vecs + epsilon, axis=1, keepdims=True)      # (B, 1)
    rot_dir = rot_vecs / angle                                              # (B, 3)
    cos = jnp.cos(angle)[:, None, :]                                        # (B, 1, 1)
    sin = jnp.sin(angle)[:, None, :]                                        # (B, 1, 1)

    rx, ry, rz = rot_dir[:, 0], rot_dir[:, 1], rot_dir[:, 2]
    zeros = jnp.zeros_like(rx)
    K = jnp.stack(
        [zeros, -rz, ry, rz, zeros, -rx, -ry, rx, zeros], axis=1
    ).reshape(-1, 3, 3)                                                     # (B, 3, 3)

    ident = jnp.eye(3, dtype=rot_vecs.dtype)[None]
    return ident + sin * K + (1.0 - cos) * jnp.matmul(K, K)


# --------------------------------------------------------------------------
# Pallas kernel: one (B*3, TN) sublane/lane-dense slab per N-tile.
#   vt_ref   : (3, TN)   f32 VMEM  -- shared template tile (x;y;z rows)
#   coef_ref : (B*3, 4)  f32 VMEM  -- row 3b+c holds [R[b,0,c], R[b,1,c],
#                                     R[b,2,c], T[b,c]]  (constant block)
#   o_ref    : (B*3, TN) f32 VMEM  -- out[3b+c, n] = (V @ R[b])[n, c] + T[b, c]
# --------------------------------------------------------------------------
def _vertex_transform_kernel(vt_ref, coef_ref, o_ref):
    vx = vt_ref[0:1, :]                       # (1, TN) -> broadcast over sublanes
    vy = vt_ref[1:2, :]
    vz = vt_ref[2:3, :]

    r0 = coef_ref[:, 0:1]                     # (B*3, 1) -> broadcast over lanes
    r1 = coef_ref[:, 1:2]
    r2 = coef_ref[:, 2:3]
    t = coef_ref[:, 3:4]

    o_ref[...] = (vx * r0 + vy * r1 + vz * r2 + t).astype(o_ref.dtype)


def _choose_tile_n(N, B, *, max_tile=65536, vmem_budget_bytes=8 << 20):
    """Pick a lane-aligned N-tile: big enough to amortize grid-step overhead,
    small enough that double-buffered (template + output) slabs fit the budget
    (conservative vs. v7x's 64 MiB VMEM / 32 MiB scoped default)."""
    bytes_per_lane = 2 * 4 * (3 + 3 * B)        # 2 buffers x f32 x (3 in + 3B out) rows
    cap = max(128, (vmem_budget_bytes // bytes_per_lane) // 128 * 128)
    cap = min(cap, max_tile)
    if N > 256:
        # Keep >= 2 grid steps so both v7x TensorCores get work on the
        # single "parallel" axis.
        two_way = ((-(-N // 2)) + 127) // 128 * 128
        cap = min(cap, two_way)
    if N <= cap:
        return N                                 # full extent is always legal
    return cap                                   # multiple of 128; trailing block masked


def prepare_template(v_template):
    """One-time layout plumbing (module-init time): (N, 3) -> lane-dense (3, N).

    The torch module's v_template buffer is this single template repeated
    across the batch; it is constant, so the transpose is hoisted out of the
    per-call path."""
    return jnp.transpose(jnp.asarray(v_template, dtype=jnp.float32))         # (3, N)


def object_model_forward(vt_T, global_orient, transl, *,
                         vertices_layout="BN3", max_tile=65536):
    """Pallas-backed equivalent of ObjectModel.forward.

    vt_T         : (3, N) float32 lane-dense template from prepare_template().
    global_orient: (B, 3) float32 axis-angle
    transl       : (B, 3) float32
    vertices_layout: "BN3" (torch convention, default) or "B3N" (kernel-native,
                     skips the final transpose round trip for downstream
                     consumers that can take xyz-major vertices).
    """
    N = vt_T.shape[1]
    B = global_orient.shape[0]
    B3 = 3 * B

    # --- tiny JAX glue: Rodrigues + coefficient table -----------------------
    rot_mats = batch_rodrigues(global_orient.reshape(-1, 3).astype(jnp.float32))  # (B,3,3)
    # coef[3b+c] = [R[b,0,c], R[b,1,c], R[b,2,c], T[b,c]]
    coef = jnp.concatenate(
        [jnp.swapaxes(rot_mats, 1, 2), transl.astype(jnp.float32)[:, :, None]],
        axis=2,
    ).reshape(B3, 4)

    # --- pallas call ---------------------------------------------------------
    tn = _choose_tile_n(N, B, max_tile=max_tile)
    n_tiles = pl.cdiv(N, tn)

    grid_spec = pltpu.PrefetchScalarGridSpec(
        num_scalar_prefetch=0,
        grid=(n_tiles,),
        in_specs=[
            # Shared template tile: read exactly once per N-tile.
            pl.BlockSpec((3, tn), lambda t: (0, t)),
            # Constant coefficient table (block index never changes).
            pl.BlockSpec((B3, 4), lambda t: (0, 0)),
        ],
        out_specs=pl.BlockSpec((B3, tn), lambda t: (0, t)),
    )

    out_flat = pl.pallas_call(
        _vertex_transform_kernel,
        grid_spec=grid_spec,
        out_shape=jax.ShapeDtypeStruct((B3, N), jnp.float32),
        compiler_params=pltpu.CompilerParams(
            dimension_semantics=("parallel",),
        ),
    )(vt_T, coef)

    verts_b3n = out_flat.reshape(B, 3, N)            # free (contiguous) reshape
    if vertices_layout == "B3N":
        vertices = verts_b3n
    else:
        # Module convention (B, N, 3): one full-bandwidth XLA transpose.  Doing
        # this in-kernel would force 3-lane masked stores (store-slot bound),
        # which is slower than the extra HBM round trip.
        vertices = jnp.swapaxes(verts_b3n, 1, 2)
    return model_output(vertices=vertices, global_orient=global_orient, transl=transl)


if __name__ == "__main__":
    # Small, deterministic synthetic setup consistent with the module:
    #   batch_size = 2, N = 512 object-mesh vertices.
    B, N = 2, 512
    key = jax.random.PRNGKey(0)
    k_v, k_go, k_t = jax.random.split(key, 3)

    # Single object template (the torch module repeats this across the batch).
    v_single = jax.random.normal(k_v, (N, 3), dtype=jnp.float32)             # (N, 3)

    # Parameters (synthetic deterministic init instead of zeros + checkpoint).
    global_orient = 0.3 * jax.random.normal(k_go, (B, 3), dtype=jnp.float32)
    transl = 0.1 * jax.random.normal(k_t, (B, 3), dtype=jnp.float32)

    vt_T = prepare_template(v_single)        # hoisted, module-init-time layout plumbing

    out = object_model_forward(vt_T, global_orient, transl)
    vertices = jax.block_until_ready(out.vertices)

    # Pure-JAX reference of the original forward (with the repeated buffer).
    v_template_rep = jnp.repeat(v_single[None], B, axis=0)                   # (B, N, 3)
    rot_ref = batch_rodrigues(global_orient)
    verts_ref = jnp.matmul(v_template_rep, rot_ref) + transl[:, None, :]

    assert vertices.shape == (B, N, 3)
    assert jnp.allclose(vertices, verts_ref, atol=1e-5, rtol=1e-5)

    # Also check the transpose-free kernel-native layout path.
    out_b3n = object_model_forward(vt_T, global_orient, transl, vertices_layout="B3N")
    verts_b3n = jax.block_until_ready(out_b3n.vertices)
    assert jnp.allclose(jnp.swapaxes(verts_b3n, 1, 2), verts_ref, atol=1e-5, rtol=1e-5)

    print("KERNEL_OK")
</pallas_src>

<mosaic_0001>
module attributes {stable_mosaic.version = 11 : i64} {
  func.func @_vertex_transform_kernel(%arg0: i32, %arg1: memref<3x256xf32, #tpu.memory_space<vmem>>, %arg2: memref<6x4xf32, #tpu.memory_space<vmem>>, %arg3: memref<6x256xf32, #tpu.memory_space<vmem>>) attributes {dimension_semantics = [#tpu.dimension_semantics<parallel>], iteration_bounds = array<i64: 2>, scalar_prefetch = 0 : i64, scratch_operands = 0 : i64, tpu.core_type = #tpu.core_type<tc>, window_params = [{transform_indices = @transform_0, window_bounds = array<i64: 3, 256>}, {pipeline_mode = #tpu.pipeline_mode<synchronous>, transform_indices = @transform_1, window_bounds = array<i64: 6, 4>}, {transform_indices = @transform_2, window_bounds = array<i64: 6, 256>}]} {
    %c0 = arith.constant 0 : index
    %c0_0 = arith.constant 0 : index
    %0 = vector.load %arg1[%c0, %c0_0] : memref<3x256xf32, #tpu.memory_space<vmem>>, vector<1x256xf32>
    %c1 = arith.constant 1 : index
    %c0_1 = arith.constant 0 : index
    %1 = vector.load %arg1[%c1, %c0_1] : memref<3x256xf32, #tpu.memory_space<vmem>>, vector<1x256xf32>
    %c2 = arith.constant 2 : index
    %c0_2 = arith.constant 0 : index
    %2 = vector.load %arg1[%c2, %c0_2] : memref<3x256xf32, #tpu.memory_space<vmem>>, vector<1x256xf32>
    %c0_3 = arith.constant 0 : index
    %c0_4 = arith.constant 0 : index
    %3 = vector.load %arg2[%c0_3, %c0_4] : memref<6x4xf32, #tpu.memory_space<vmem>>, vector<6x1xf32>
    %c0_5 = arith.constant 0 : index
    %c1_6 = arith.constant 1 : index
    %4 = vector.load %arg2[%c0_5, %c1_6] : memref<6x4xf32, #tpu.memory_space<vmem>>, vector<6x1xf32>
    %c0_7 = arith.constant 0 : index
    %c2_8 = arith.constant 2 : index
    %5 = vector.load %arg2[%c0_7, %c2_8] : memref<6x4xf32, #tpu.memory_space<vmem>>, vector<6x1xf32>
    %c0_9 = arith.constant 0 : index
    %c3 = arith.constant 3 : index
    %6 = vector.load %arg2[%c0_9, %c3] : memref<6x4xf32, #tpu.memory_space<vmem>>, vector<6x1xf32>
    %7 = vector.broadcast %0 : vector<1x256xf32> to vector<6x256xf32>
    %8 = vector.broadcast %3 : vector<6x1xf32> to vector<6x256xf32>
    %9 = arith.mulf %7, %8 : vector<6x256xf32>
    %10 = vector.broadcast %1 : vector<1x256xf32> to vector<6x256xf32>
    %11 = vector.broadcast %4 : vector<6x1xf32> to vector<6x256xf32>
    %12 = arith.mulf %10, %11 : vector<6x256xf32>
    %13 = arith.addf %9, %12 : vector<6x256xf32>
    %14 = vector.broadcast %2 : vector<1x256xf32> to vector<6x256xf32>
    %15 = vector.broadcast %5 : vector<6x1xf32> to vector<6x256xf32>
    %16 = arith.mulf %14, %15 : vector<6x256xf32>
    %17 = arith.addf %13, %16 : vector<6x256xf32>
    %18 = vector.broadcast %6 : vector<6x1xf32> to vector<6x256xf32>
    %19 = arith.addf %17, %18 : vector<6x256xf32>
    %c0_10 = arith.constant 0 : index
    %c0_11 = arith.constant 0 : index
    %20 = vector.load %arg3[%c0_10, %c0_11] : memref<6x256xf32, #tpu.memory_space<vmem>>, vector<6x256xf32>
    tpu.vector_store %arg3[%c0_10, %c0_11], %19 {strides = array<i32>} : memref<6x256xf32, #tpu.memory_space<vmem>>, vector<6x256xf32>,
    return
  }
  func.func @transform_0(%arg0: i32) -> (i32, i32) {
    %c0_i32 = arith.constant 0 : i32
    %c0_i32_0 = arith.constant 0 : i32
    return %c0_i32, %arg0 : i32, i32
  }
  func.func @transform_1(%arg0: i32) -> (i32, i32) {
    %c0_i32 = arith.constant 0 : i32
    %c0_i32_0 = arith.constant 0 : i32
    %c0_i32_1 = arith.constant 0 : i32
    return %c0_i32, %c0_i32_0 : i32, i32
  }
  func.func @transform_2(%arg0: i32) -> (i32, i32) {
    %c0_i32 = arith.constant 0 : i32
    %c0_i32_0 = arith.constant 0 : i32
    return %c0_i32, %arg0 : i32, i32
  }
}

</mosaic_0001>

<bundles_post_ra>
// kernel: tpu_custom_call.1
= control target key start
LH: loop header
LB: loop body
LE: loop exit
PB: predicated region body
PF: predicated region fallthrough
CT: control target
= control target key end

     0   :  { %7 = vsyncpa [#allocation3], 0  ;;  %s656_s0 = inlined_call_operand.hbm [shape: f32[3,512], index: 0, kind: input, shape index: {}]   ;;  %s657_s1 = inlined_call_operand.vmem [shape: f32[6,4], index: 1, kind: input, shape index: {}]   ;;  %s658_s2 = inlined_call_operand.hbm [shape: f32[6,512], index: 2, kind: output, shape index: {}]  }
   0x1   :  { %9 = vsyncpa [#allocation3 + $0x1], 0 }
   0x2   :  { %10 = vsyncpa [#allocation4], 0 }
   0x3   :  { %12 = vsyncpa [#allocation4 + $0x1], 0  ;;  %s505_s9 = smov 0   ;;  %s507_s10 = smov 0  }
   0x4   :  { %s509_s11 = smov 0   ;;  %s511_s12 = smov 0  }
   0x5 LB: > { %s526_s13 = sadd.s32 4294967295, %s482_s12   ;;  %s317_s14 = sadd.s32 4294967294, %s482_s12   ;;  %s482_s12 = sphi %s511_s12, %s675_s12   ;;  %s478_s11 = sphi %s509_s11, %s674_s11   ;;  %s474_s10 = sphi %s507_s10, %s673_s10   ;;  %s470_s9 = sphi %s505_s9, %s672_s9  }
   0x6   : > { %s530_s15 = sadd.s32 1, %s482_s12   ;;  %s25_s16 = sadd.s32 1, %s478_s11 }
   0x7   : > { %s22_s17 = ssub.s32 %s482_s12, %s530_s15  ;;  %p32_p0 = scmp.ne.s32.totalorder %s478_s11, %s474_s10 }
   0x8   : > { %p23_p1 = scmp.eq.s32.totalorder %s22_s17, 0  ;;  %p33_p2 = scmp.eq.s32.totalorder %s482_s12, 0 }
   0x9   : > { %p38_p3 = scmp.ne.s32.totalorder %s474_s10, %s470_s9  ;;  %p39_p4 = scmp.eq.s32.totalorder %s526_s13, 0 }
   0xa   : > { %s542_s18 = scalar_select %p23_p1, %s478_s11, %s25_s16  }
   0xb   : > { %p544_p5 = por %p33_p2, %p32_p0  ;;  %p548_p6 = por %p39_p4, %p38_p3 }
   0xc   : > { %p83_p7 = scmp.eq.s32.totalorder %s526_s13, 1  ;;  %p89_p8 = scmp.eq.s32.totalorder %s317_s14, 1 }
   0xd   : > { %s662_s20 = scalar_select %p548_p6, 1, 0 }
   0xe   : > { %p347_p10 = scmp.lt.s32.totalorder %s482_s12, 2  ;;  %p555_p11 = por %p83_p7, %p32_p0 }
   0xf   : > { %p559_p12 = por %p89_p8, %p38_p3  ;;  %s112_s23 = sand.u32 1, %s478_s11  }
  0x10   : > { %s663_s21 = scalar_select %p555_p11, 1, 0 }
  0x11   : > { %s664_s22 = scalar_select %p559_p12, 1, 0 }
  0x12   : > { %s333_s24 = sshll.u32 %s482_s12, 7  ;;  %s320_s25 = sshll.u32 %s112_s23, 3 }
  0x13   : > { %s568_s28 = scalar_lea.hbm %s656_s0, %s333_s24  ;;  %s116_s29 = scalar_lea.vmem [#allocation2], %s320_s25 }
  0x14   : > { %s124_s30 = sshll.u32 %s116_s29, 4  ;;  %p572_p13 = pnand %p347_p10, %p544_p5  ;;  %s576_s30 = int_to_ptr.vmem [resolvable:$true] %s124_s30 }
  0x15   : > { %s113_s4 = scalar_lea.sflag [#allocation3], %s112_s23  ;;  %s390_s5 = scalar_lea.hbm %s568_s28, 128 }
  0x16   : > { %p391_p2 = scmp.ne.s32.totalorder %s568_s28, %s390_s5  ;;  %p392_p3 = pneg %p572_p13 }
  0x17   : > { %s395_s8 = scalar_lea.hbm %s656_s0, 256  ;;  %p396_p5 = scmp.lt.s32.totalorder %s568_s28, %s656_s0 }
  0x18   : > { %p393_p4 = pnand %p392_p3, %p391_p2  ;;  %p397_p8 = scmp.lt.s32.totalorder %s395_s8, %s390_s5 }
  0x1a   : > { %p394_p7 = pneg %p393_p4  ;;  %p398_p10 = por %p397_p8, %p396_p5 }
  0x1c   : > { %p399_p9 = pnand %p398_p10, %p394_p7 }
  0x1e   : > { %402 = shalt.err (!%p399_p9)
}
  0x1f   : > { %s403_s17 = scalar_lea.vmem %s576_s30, 128  ;;  %s484_s19 = smov [#allocation2]  }
  0x20   : > { %p404_p0 = scmp.ne.s32.totalorder %s576_s30, %s403_s17  ;;  %s408_s23 = sshll.u32 %s484_s19, 4  ;;  %s409_s23 = int_to_ptr.vmem [resolvable:$false] %s408_s23 }
  0x21   : > { %s410_s24 = scalar_lea.vmem %s409_s23, 256  ;;  %p411_p4 = scmp.lt.s32.totalorder %s576_s30, %s409_s23 }
  0x22   : > { %p406_p1 = pnand %p404_p0, %p392_p3  ;;  %p412_p12 = scmp.lt.s32.totalorder %s410_s24, %s403_s17 }
  0x24   : > { %p407_p2 = pneg %p406_p1  ;;  %p413_p11 = por %p412_p12, %p411_p4 }
  0x26   : > { %p414_p6 = pnand %p413_p11, %p407_p2 }
  0x28   : > { %417 = shalt.err (!%p414_p6)
}
  0x29   : > { %342 = dma.hbm_to_vmem [thread:$0]  (!%p572_p13), %s568_s28, 128, %s576_s30, %s113_s4  }
  0x2a   : > { %p666_p9 = scmp.lt.s32.totalorder %s482_s12, 3  ;;  %p667_p7 = scmp.ge.s32.totalorder %s482_s12, 1 }
  0x2c   : > { %p130_p0 = pnand %p667_p7, %p666_p9 }
  0x2d   : > { %s603_s25 = sand.u32 (!%p130_p0), 1, %s474_s10   ;;  %p668_p6 = scmp.ne.s32.totalorder (!%p130_p0), %s662_s20, 0 }
  0x2e   : > { %133 = sbr.rel (%p130_p0) target bundleno = 204 (0xcc), region = 28  ;;  %s324_s26 = sshll.u32 (!%p130_p0), %s603_s25, 3 }
  0x2f   : > { %s136_s27 = scalar_lea.sflag (!%p130_p0), [#allocation3], %s603_s25  ;;  %s139_s29 = scalar_lea.vmem (!%p130_p0), [#allocation2], %s324_s26 }
  0x33   : > { %461 = dma.done.wait (%p668_p6), %s136_s27, 128  }
  0x34   : > { %463 = vsyncadd (%p668_p6), %s136_s27, 4294967168  ;;  %v485_v0 = vmov 0   ;;  %v486_v1 = vmov 2   ;;  %v167_v2 = vld [vmem:[%s657_s1] sm:$0x3f]  ;;  %v487_v3 = vmov 1   ;;  %v169_v5 = vlaneseq }
  0x35   : > { %385 = vset.pattern.permute.xlu0 %v485_v0  ;;  %387 = vset.pattern.permute.xlu1 %v486_v1  ;;  %v488_v4 = vmov 3   ;;  %v162_v9 = vld [vmem:[%s139_s29] ss:$4 sm:$0x3]  ;;  %s325_s20 = sshll.u32 %s603_s25, 4  ;;  %s334_s3 = sshll.u32 %s526_s13, 8 }
  0x36   : > { %181 = vperm.xlu0 %385, %v167_v2   ;;  %217 = vperm.xlu1 %387, %v167_v2   ;;  %v170_v6 = vshrl.u32 %v169_v5, 7  ;;  %v326_v10 = vld [vmem:[%s139_s29 + $0x1] ss:$4 sm:$0x3]  ;;  %s159_s4 = scalar_lea.vmem [#allocation5], %s325_s20  ;;  %s619_s8 = scalar_lea.hbm %s658_s2, %s334_s3 }
  0x37   : > { %v327_v11 = vld [vmem:[%s139_s29 + $0x2] ss:$4 sm:$0x3]  ;;  %s247_s5 = sshll.u32 %s159_s4, 4  ;;  %s233_s14 = scalar_lea.sflag [#allocation4], %s603_s25  ;;  %s248_s5 = int_to_ptr.vmem [resolvable:$true] %s247_s5 }
  0x38   : > { %v171_v7 = vsub.s32 0, %v170_v6  ;;  %v175_v8 = vsub.s32 1, %v170_v6  ;;  %s418_s16 = scalar_lea.vmem %s248_s5, 256  ;;  %p669_p12 = scmp.ne.s32.totalorder %s663_s21, 0 }
  0x39   : > { %p419_p11 = scmp.ne.s32.totalorder %s248_s5, %s418_s16  ;;  %s489_s13 = smov [#allocation5]  }
  0x3a   : > { %386 = vset.pattern.permute.xlu0 %v487_v3  ;;  %388 = vset.pattern.permute.xlu1 %v488_v4  ;;  %v172_v13 = vrot.slane %v162_v9, %v171_v7  ;;  %v176_v14 = vrot.slane %v162_v9, %v175_v8  ;;  %v190_v15 = vrot.slane %v326_v10, %v171_v7  ;;  %s422_s17 = sshll.u32 %s489_s13, 4  ;;  %s423_s17 = int_to_ptr.vmem [resolvable:$false] %s422_s17 }
  0x3b   : > { %198 = vperm.xlu0 %386, %v167_v2   ;;  %225 = vperm.xlu1 %388, %v167_v2   ;;  %v194_v16 = vrot.slane %v326_v10, %v175_v8  ;;  %v209_v17 = vrot.slane %v327_v11, %v171_v7  ;;  %v213_v18 = vrot.slane %v327_v11, %v175_v8  ;;  %p420_p13 = pnand %p419_p11, %p669_p12  ;;  %s424_s19 = scalar_lea.vmem %s423_s17, 512 }
  0x3c   : > { %p425_p3 = scmp.lt.s32.totalorder %s248_s5, %s423_s17  ;;  %p426_p5 = scmp.lt.s32.totalorder %s424_s19, %s418_s16 }
  0x3d   : > { %p421_p1 = pneg %p420_p13 }
  0x3e   : > { %p427_p8 = por %p426_p5, %p425_p3 }
  0x3f   : > { %389 = vset.pattern.permute.xlu0 %v488_v4 }
  0x40   : > { %p428_p10 = pnand %p427_p8, %p421_p1 }
  0xb1   : > { %v182_v12 = vpop.permute.xlu0 %181  ;;  %v218_v19 = vpop.permute.xlu1 %217 }
  0xb2   : > { %v184_v20 = vmul.f32 %v182_v12, %v172_v13  ;;  %v185_v21 = vmul.f32 %v182_v12, %v176_v14  ;;  %v220_v25 = vmul.f32 %v218_v19, %v209_v17  ;;  %v221_v26 = vmul.f32 %v218_v19, %v213_v18 }
  0xb6   : > { %v199_v22 = vpop.permute.xlu0 %198  ;;  %v226_v29 = vpop.permute.xlu1 %225 }
  0xb7   : > { %v201_v23 = vmul.f32 %v199_v22, %v190_v15  ;;  %v202_v24 = vmul.f32 %v199_v22, %v194_v16 }
  0xb9   : > { %v203_v27 = vadd.f32 %v201_v23, %v184_v20  ;;  %v204_v28 = vadd.f32 %v202_v24, %v185_v21 }
  0xbb   : > { %v222_v30 = vadd.f32 %v220_v25, %v203_v27  ;;  %v223_v31 = vadd.f32 %v221_v26, %v204_v28 }
  0xbd   : > { %v228_v32 = vadd.f32 %v226_v29, %v222_v30  ;;  %v229_v33 = vadd.f32 %v226_v29, %v223_v31 }
  0xbf   : > { %230 = vst [vmem:[%s159_s4] sm:$0x3f] %v228_v32  ;;  %231 = vst [vmem:[%s159_s4 + $0x8] sm:$0x3f] %v229_v33 }
  0xc0   : > { %431 = shalt.err (!%p428_p10)
}
  0xc1   : > { %s432_s23 = scalar_lea.hbm %s619_s8, 256  ;;  %s436_s26 = scalar_lea.hbm %s658_s2, 512 }
  0xc2   : > { %p433_p2 = scmp.ne.s32.totalorder %s619_s8, %s432_s23  ;;  %p437_p7 = scmp.lt.s32.totalorder %s619_s8, %s658_s2 }
  0xc3   : > { %p438_p0 = scmp.lt.s32.totalorder %s436_s26, %s432_s23 }
  0xc4   : > { %p434_p4 = pnand %p433_p2, %p669_p12 }
  0xc5   : > { %p439_p6 = por %p438_p0, %p437_p7 }
  0xc6   : > { %p435_p9 = pneg %p434_p4 }
  0xc8   : > { %p440_p11 = pnand %p439_p6, %p435_p9 }
  0xca   : > { %443 = shalt.err (!%p440_p11)
}
  0xcb   : > { %337 = dma.vmem_to_hbm [thread:$0]  (%p669_p12), %s248_s5, 256, %s619_s8, %s233_s14  }
  0xcc PF: > { %s259_s28 = sand.u32 1, %s470_s9   ;;  %p670_p13 = scmp.ne.s32.totalorder %s664_s22, 0 }
  0xcd   : > { %p671_p1 = scmp.ge.s32.totalorder %s482_s12, 2  ;;  %s260_s30 = scalar_lea.sflag [#allocation4], %s259_s28 }
  0xcf   : > { %p344_p3 = pnand %p671_p1, %p670_p13 }
  0xd1   : > { %p345_p5 = pneg %p344_p3 }
  0xd3   : > { %465 = dma.done.wait (%p345_p5), %s260_s30, 256  }
  0xd4   : > { %467 = vsyncadd (%p345_p5), %s260_s30, 4294967040  ;;  %p15_p8 = scmp.ge.s32.totalorder %s530_s15, 4   ;;  %s672_s9 = smov %s474_s10 }
  0xd5   : > { %s673_s10 = smov %s478_s11  ;;  %s674_s11 = smov %s542_s18 }
  0xd6   : > { %s675_s12 = smov %s530_s15  ;;  %17 = sbr.rel (!%p15_p8) target bundleno = 5 (0x5), region = 75 }
  0xdb   :  { %265 = vsyncpa [#allocation3], 1 }
  0xdc   :  { %267 = vsyncpa [#allocation3 + $0x1], 1 }
  0xdd   :  { %268 = vsyncpa [#allocation4], 1 }
  0xde   :  { %270 = vsyncpa [#allocation4 + $0x1], 1 }

</bundles_post_ra>
